<compile_context>
chip_gen: v5e
topology: v5e:2x2
jax: 0.10.0
libtpu: 0.0.40
codegen_flags: <defaults>
</compile_context>

<pallas_src>
import jax
import jax.numpy as jnp
from jax import lax
from jax.experimental import pallas as pl
from jax.experimental.pallas import tpu as pltpu

_MIB = 1024 * 1024


def _round_up(x: int, m: int) -> int:
    return ((x + m - 1) // m) * m


def _vmem_budget_bytes():
    """(tile-sizing budget, compiler vmem limit) derived from the real chip."""
    try:
        phys = int(pltpu.get_tpu_info().vmem_capacity_bytes)
    except Exception:
        phys = 64 * _MIB                         # conservative (v7x-sized) fallback
    budget = min(phys - 12 * _MIB, 100 * _MIB)   # headroom for compiler scratch
    limit = min(phys - 4 * _MIB, budget + 16 * _MIB)
    return budget, limit


def _proj_logsoftmax_kernel(x_ref, w_ref, b_ref, o_ref, acc_ref, m_ref, l_ref):
    # x_ref: (tm, d_model) bf16   w_ref: (d_model, tn) bf16   b_ref: (1, tn) f32
    # o_ref: (tm, V_pad) out_dtype (row-resident, written only at finalize)
    # acc_ref: (tm, V_pad) f32 scratch (raw logits; keeps bf16 output exact)
    # m_ref/l_ref: (tm, 1) f32 scratch (running max / running sum-of-exp)
    j = pl.program_id(1)
    nv = pl.num_programs(1)
    tn = w_ref.shape[1]

    @pl.when(j == 0)
    def _init():
        m_ref[...] = jnp.full(m_ref.shape, -jnp.inf, m_ref.dtype)
        l_ref[...] = jnp.zeros(l_ref.shape, l_ref.dtype)

    # bf16 x bf16 matmul with f32 accumulation on the MXU.
    logits = jnp.dot(x_ref[...], w_ref[...], preferred_element_type=jnp.float32)
    logits = logits + b_ref[...]  # broadcast (1, tn) bias -> (tm, tn), f32

    # Online log-sum-exp update (flash-softmax style).
    m_prev = m_ref[...]
    m_new = jnp.maximum(m_prev, jnp.max(logits, axis=-1, keepdims=True))
    l_ref[...] = (l_ref[...] * jnp.exp(m_prev - m_new)
                  + jnp.sum(jnp.exp(logits - m_new), axis=-1, keepdims=True))
    m_ref[...] = m_new

    # Stash raw f32 logits at this vocab tile's lane-aligned column offset.
    col = pl.multiple_of(j * tn, 128)
    acc_ref[:, pl.ds(col, tn)] = logits

    # After the last vocab tile: log-probs = logits_f32 - lse, written to the
    # output block in tn-sized chunks (bounds temporaries, f32 math, cast last).
    @pl.when(j == nv - 1)
    def _finalize():
        lse = m_ref[...] + jnp.log(l_ref[...])   # (tm, 1) f32
        n_chunks = acc_ref.shape[1] // tn        # static

        def body(k, carry):
            c = pl.multiple_of(k * tn, 128)
            chunk = acc_ref[:, pl.ds(c, tn)]
            o_ref[:, pl.ds(c, tn)] = (chunk - lse).astype(o_ref.dtype)
            return carry

        lax.fori_loop(0, n_chunks, body, 0)


def prepare_projection_weights(weight, bias):
    """One-time conversion: bf16 cast + zero-pad vocab to a multiple of 512
    (bias padded with -1e30 so padded columns never affect the LSE).

    Cache the result and pass it to projection_layer(..., vocab=true_vocab) so
    the full (d_model, vocab) weight is not re-cast/re-padded on every call.
    """
    d_model, vocab = weight.shape
    v_pad = _round_up(vocab, 512)
    w = weight if weight.dtype == jnp.bfloat16 else weight.astype(jnp.bfloat16)
    b = bias.reshape(1, -1)
    if b.dtype != jnp.float32:
        b = b.astype(jnp.float32)
    if v_pad != vocab:
        w = jnp.pad(w, ((0, 0), (0, v_pad - vocab)))
        b = jnp.pad(b, ((0, 0), (0, v_pad - vocab)), constant_values=-1e30)
    return w, b, vocab


def projection_layer(x, weight, bias, *, tm=None, tn=512,
                     out_dtype=jnp.bfloat16, vocab=None):
    """log_softmax(x @ weight + bias, axis=-1).

    x: (batch, seq, d_model); weight: (d_model, V); bias: (V,) or (1, V).
    weight/bias may be pre-converted via prepare_projection_weights (then pass
    the true `vocab`).  Returns (batch, seq, vocab) in out_dtype.
    """
    batch, seq, d_model = x.shape
    V = weight.shape[1]
    if vocab is None:
        vocab = V
    M = batch * seq
    out_itemsize = jnp.dtype(out_dtype).itemsize

    budget, vmem_limit = _vmem_budget_bytes()

    # --- vocab tile: multiple of 128; keep the double-buffered W tile modest ---
    tn = min(tn, _round_up(V, 128))
    tn = max(128, _round_up(tn, 128))
    while tn > 128 and 2 * d_model * tn * 2 > budget // 3:
        tn = max(128, (tn // 2 // 128) * 128)
    V_pad = _round_up(V, tn)
    nv = V_pad // tn

    # --- row tile: solve against the real VMEM footprint ---
    fixed = 2 * d_model * tn * 2 + 2 * tn * 4          # W (2 bufs, bf16) + bias
    per_row = (2 * d_model * 2                          # x tile (2 bufs, bf16)
               + V_pad * 4                              # f32 logits staging scratch
               + 2 * V_pad * out_itemsize               # output block (~2 bufs)
               + 2 * 512)                               # m/l scratch (lane-padded)
    tm_budget = max(8, (budget - fixed) // per_row)

    if tm is None:
        tm = 512                                        # cap; MXU rows are 256 on v6e/v7x
    tm = min(tm, tm_budget, _round_up(M, 8))
    if tm >= 256:
        tm = (tm // 256) * 256                          # full MXU rows
    elif tm >= 128:
        tm = (tm // 128) * 128
    else:
        tm = max(8, (tm // 8) * 8)                      # tiny problems only
    # TODO(synk): on v7x (2 TCs) halve tm when M_pad // tm == 1 so both cores get rows.
    M_pad = _round_up(M, tm)

    # Third W pipeline buffer only when headroom exists and it can actually help.
    used = fixed + tm * per_row
    if nv >= 3 and used + d_model * tn * 2 <= budget:
        w_spec = pl.BlockSpec((d_model, tn), lambda i, j: (0, j),
                              pipeline_mode=pl.Buffered(3))
    else:
        w_spec = pl.BlockSpec((d_model, tn), lambda i, j: (0, j))

    # --- inputs: activation cast per call; weight cast/pad skipped if prepared ---
    x2d = x.reshape(M, d_model)
    if x2d.dtype != jnp.bfloat16:
        x2d = x2d.astype(jnp.bfloat16)
    w = weight if weight.dtype == jnp.bfloat16 else weight.astype(jnp.bfloat16)
    b2d = bias.reshape(1, -1)
    if b2d.dtype != jnp.float32:
        b2d = b2d.astype(jnp.float32)

    if M_pad != M:
        x2d = jnp.pad(x2d, ((0, M_pad - M), (0, 0)))
    if V_pad != V:
        # zero-pad W / -1e30 bias so padded vocab columns never affect the LSE.
        w = jnp.pad(w, ((0, 0), (0, V_pad - V)))
        b2d = jnp.pad(b2d, ((0, 0), (0, V_pad - V)), constant_values=-1e30)

    grid = (M_pad // tm, nv)

    cost = pl.CostEstimate(
        flops=2 * M_pad * d_model * V_pad,
        transcendentals=M_pad * V_pad,
        bytes_accessed=(M_pad * d_model * 2                 # x (bf16)
                        + grid[0] * d_model * V_pad * 2     # W re-read per row tile
                        + V_pad * 4                         # bias
                        + M_pad * V_pad * out_itemsize),    # output
    )

    out2d = pl.pallas_call(
        _proj_logsoftmax_kernel,
        out_shape=jax.ShapeDtypeStruct((M_pad, V_pad), out_dtype),
        grid_spec=pltpu.PrefetchScalarGridSpec(
            num_scalar_prefetch=0,
            grid=grid,
            in_specs=[
                pl.BlockSpec((tm, d_model), lambda i, j: (i, 0)),   # x rows
                w_spec,                                             # W vocab tile
                pl.BlockSpec((1, tn), lambda i, j: (0, j)),         # bias tile
            ],
            out_specs=pl.BlockSpec((tm, V_pad), lambda i, j: (i, 0)),  # row-resident
            scratch_shapes=[
                pltpu.VMEM((tm, V_pad), jnp.float32),  # f32 logits staging
                pltpu.VMEM((tm, 1), jnp.float32),      # running max m
                pltpu.VMEM((tm, 1), jnp.float32),      # running sum l
            ],
        ),
        compiler_params=pltpu.CompilerParams(
            dimension_semantics=("parallel", "arbitrary"),
            vmem_limit_bytes=int(vmem_limit),
        ),
        cost_estimate=cost,
    )(x2d, w, b2d)

    return out2d[:M, :vocab].reshape(batch, seq, vocab)


if __name__ == "__main__":
    # Small deterministic setup consistent with the module's forward.
    batch, seq, d_model, vocab_size = 2, 8, 32, 128

    key = jax.random.PRNGKey(0)
    kx, kw, kb = jax.random.split(key, 3)

    x = jax.random.normal(kx, (batch, seq, d_model), dtype=jnp.float32)
    # nn.Linear(d_model, vocab_size): weight (vocab, d_model), bias (vocab,).
    # The kernel takes the transposed weight (d_model, vocab).
    weight = jax.random.normal(kw, (d_model, vocab_size), dtype=jnp.float32) * 0.05
    bias = jax.random.normal(kb, (vocab_size,), dtype=jnp.float32) * 0.01

    ref = jax.nn.log_softmax(x @ weight + bias, axis=-1)

    # f32-output path (tight tolerance: only the bf16 matmul inputs are lossy).
    out_f32 = projection_layer(x, weight, bias, out_dtype=jnp.float32)
    jax.block_until_ready(out_f32)
    assert out_f32.shape == (batch, seq, vocab_size)
    err32 = float(jnp.max(jnp.abs(out_f32 - ref)))
    assert jnp.allclose(out_f32, ref, atol=2e-2, rtol=2e-2), f"f32 max_err={err32}"

    # Default bf16-output path with hoisted (cacheable) weight conversion.
    w_prep, b_prep, true_vocab = prepare_projection_weights(weight, bias)
    out_bf16 = projection_layer(x, w_prep, b_prep, vocab=true_vocab)
    jax.block_until_ready(out_bf16)
    assert out_bf16.shape == (batch, seq, vocab_size)
    out_bf16_f32 = out_bf16.astype(jnp.float32)
    err16 = float(jnp.max(jnp.abs(out_bf16_f32 - ref)))
    # Subtraction is done in f32; remaining error is the final bf16 cast.
    assert jnp.allclose(out_bf16_f32, ref, atol=6e-2, rtol=6e-2), f"bf16 max_err={err16}"

    print("KERNEL_OK")
</pallas_src>

<mosaic_0001>
module attributes {stable_mosaic.version = 11 : i64} {
  func.func @_proj_logsoftmax_kernel(%arg0: i32, %arg1: i32, %arg2: memref<16x32xbf16, #tpu.memory_space<vmem>>, %arg3: memref<32x128xbf16, #tpu.memory_space<vmem>>, %arg4: memref<1x128xf32, #tpu.memory_space<vmem>>, %arg5: memref<16x128xf32, #tpu.memory_space<vmem>>, %arg6: memref<16x128xf32, #tpu.memory_space<vmem>>, %arg7: memref<16x1xf32, #tpu.memory_space<vmem>>, %arg8: memref<16x1xf32, #tpu.memory_space<vmem>>) attributes {dimension_semantics = [#tpu.dimension_semantics<parallel>, #tpu.dimension_semantics<arbitrary>], iteration_bounds = array<i64: 1, 1>, scalar_prefetch = 0 : i64, scratch_operands = 3 : i64, tpu.core_type = #tpu.core_type<tc>, window_params = [{transform_indices = @transform_0, window_bounds = array<i64: 16, 32>}, {transform_indices = @transform_1, window_bounds = array<i64: 32, 128>}, {transform_indices = @transform_2, window_bounds = array<i64: 1, 128>}, {transform_indices = @transform_3, window_bounds = array<i64: 16, 128>}]} {
    %c0_i32 = arith.constant 0 : i32
    %0 = arith.cmpi eq, %arg1, %c0_i32 : i32
    %1 = arith.extui %0 : i1 to i32
    %c0_i32_0 = arith.constant 0 : i32
    %2 = arith.cmpi ne, %1, %c0_i32_0 : i32
    scf.if %2 {
      %cst_19 = arith.constant 0xFF800000 : f32
      %32 = vector.broadcast %cst_19 : f32 to vector<16x1xf32>
      %c0_20 = arith.constant 0 : index
      %c0_21 = arith.constant 0 : index
      %33 = vector.load %arg7[%c0_20, %c0_21] : memref<16x1xf32, #tpu.memory_space<vmem>>, vector<16x1xf32>
      tpu.vector_store %arg7[%c0_20, %c0_21], %32 {strides = array<i32>} : memref<16x1xf32, #tpu.memory_space<vmem>>, vector<16x1xf32>,
      %cst_22 = arith.constant 0.000000e+00 : f32
      %34 = vector.broadcast %cst_22 : f32 to vector<16x1xf32>
      %c0_23 = arith.constant 0 : index
      %c0_24 = arith.constant 0 : index
      %35 = vector.load %arg8[%c0_23, %c0_24] : memref<16x1xf32, #tpu.memory_space<vmem>>, vector<16x1xf32>
      tpu.vector_store %arg8[%c0_23, %c0_24], %34 {strides = array<i32>} : memref<16x1xf32, #tpu.memory_space<vmem>>, vector<16x1xf32>,
    } else {
    }
    %c0 = arith.constant 0 : index
    %c0_1 = arith.constant 0 : index
    %3 = vector.load %arg2[%c0, %c0_1] : memref<16x32xbf16, #tpu.memory_space<vmem>>, vector<16x32xbf16>
    %c0_2 = arith.constant 0 : index
    %c0_3 = arith.constant 0 : index
    %4 = vector.load %arg3[%c0_2, %c0_3] : memref<32x128xbf16, #tpu.memory_space<vmem>>, vector<32x128xbf16>
    %cst = arith.constant dense<0.000000e+00> : vector<16x128xf32>
    %5 = tpu.matmul %3, %4, %cst {dimension_numbers = #tpu.dot_dimension_numbers<[1], [0], [0], [1], [0, 0, 1, 1], [], []>} : vector<16x32xbf16>, vector<32x128xbf16>, vector<16x128xf32> -> vector<16x128xf32>
    %c0_4 = arith.constant 0 : index
    %c0_5 = arith.constant 0 : index
    %6 = vector.load %arg4[%c0_4, %c0_5] : memref<1x128xf32, #tpu.memory_space<vmem>>, vector<1x128xf32>
    %7 = vector.broadcast %6 : vector<1x128xf32> to vector<16x128xf32>
    %8 = arith.addf %5, %7 : vector<16x128xf32>
    %c0_6 = arith.constant 0 : index
    %c0_7 = arith.constant 0 : index
    %9 = vector.load %arg7[%c0_6, %c0_7] : memref<16x1xf32, #tpu.memory_space<vmem>>, vector<16x1xf32>
    %cst_8 = arith.constant dense<0xFF800000> : vector<16xf32>
    %10 = vector.multi_reduction <maximumf>, %8, %cst_8 [1] : vector<16x128xf32> to vector<16xf32>
    %11 = vector.shape_cast %10 : vector<16xf32> to vector<16x1xf32>
    %12 = arith.maximumf %9, %11 : vector<16x1xf32>
    %c0_9 = arith.constant 0 : index
    %c0_10 = arith.constant 0 : index
    %13 = vector.load %arg8[%c0_9, %c0_10] : memref<16x1xf32, #tpu.memory_space<vmem>>, vector<16x1xf32>
    %14 = arith.subf %9, %12 : vector<16x1xf32>
    %15 = math.exp %14 : vector<16x1xf32>
    %16 = arith.mulf %13, %15 : vector<16x1xf32>
    %17 = vector.broadcast %12 : vector<16x1xf32> to vector<16x128xf32>
    %18 = arith.subf %8, %17 : vector<16x128xf32>
    %19 = math.exp %18 : vector<16x128xf32>
    %cst_11 = arith.constant dense<0.000000e+00> : vector<16xf32>
    %20 = vector.multi_reduction <add>, %19, %cst_11 [1] : vector<16x128xf32> to vector<16xf32>
    %21 = vector.shape_cast %20 : vector<16xf32> to vector<16x1xf32>
    %22 = arith.addf %16, %21 : vector<16x1xf32>
    %c0_12 = arith.constant 0 : index
    %c0_13 = arith.constant 0 : index
    %23 = vector.load %arg8[%c0_12, %c0_13] : memref<16x1xf32, #tpu.memory_space<vmem>>, vector<16x1xf32>
    tpu.vector_store %arg8[%c0_12, %c0_13], %22 {strides = array<i32>} : memref<16x1xf32, #tpu.memory_space<vmem>>, vector<16x1xf32>,
    %c0_14 = arith.constant 0 : index
    %c0_15 = arith.constant 0 : index
    %24 = vector.load %arg7[%c0_14, %c0_15] : memref<16x1xf32, #tpu.memory_space<vmem>>, vector<16x1xf32>
    tpu.vector_store %arg7[%c0_14, %c0_15], %12 {strides = array<i32>} : memref<16x1xf32, #tpu.memory_space<vmem>>, vector<16x1xf32>,
    %c128_i32 = arith.constant 128 : i32
    %25 = arith.muli %arg1, %c128_i32 : i32
    %26 = tpu.assume_multiple %25, 128 : i32
    %c0_16 = arith.constant 0 : index
    %27 = arith.index_cast %26 : i32 to index
    %28 = vector.load %arg6[%c0_16, %27] : memref<16x128xf32, #tpu.memory_space<vmem>>, vector<16x128xf32>
    tpu.vector_store %arg6[%c0_16, %27], %8 {strides = array<i32>} : memref<16x128xf32, #tpu.memory_space<vmem>>, vector<16x128xf32>,
    %c0_i32_17 = arith.constant 0 : i32
    %29 = arith.cmpi eq, %arg1, %c0_i32_17 : i32
    %30 = arith.extui %29 : i1 to i32
    %c0_i32_18 = arith.constant 0 : i32
    %31 = arith.cmpi ne, %30, %c0_i32_18 : i32
    scf.if %31 {
      %c0_19 = arith.constant 0 : index
      %c0_20 = arith.constant 0 : index
      %32 = vector.load %arg7[%c0_19, %c0_20] : memref<16x1xf32, #tpu.memory_space<vmem>>, vector<16x1xf32>
      %c0_21 = arith.constant 0 : index
      %c0_22 = arith.constant 0 : index
      %33 = vector.load %arg8[%c0_21, %c0_22] : memref<16x1xf32, #tpu.memory_space<vmem>>, vector<16x1xf32>
      %34 = math.log %33 : vector<16x1xf32>
      %35 = arith.addf %32, %34 : vector<16x1xf32>
      %c0_i32_23 = arith.constant 0 : i32
      %c128_i32_24 = arith.constant 128 : i32
      %36 = arith.muli %c0_i32_23, %c128_i32_24 : i32
      %37 = tpu.assume_multiple %36, 128 : i32
      %c0_25 = arith.constant 0 : index
      %38 = arith.index_cast %37 : i32 to index
      %39 = vector.load %arg6[%c0_25, %38] : memref<16x128xf32, #tpu.memory_space<vmem>>, vector<16x128xf32>
      %40 = vector.broadcast %35 : vector<16x1xf32> to vector<16x128xf32>
      %41 = arith.subf %39, %40 : vector<16x128xf32>
      %c0_26 = arith.constant 0 : index
      %42 = arith.index_cast %37 : i32 to index
      %43 = vector.load %arg5[%c0_26, %42] : memref<16x128xf32, #tpu.memory_space<vmem>>, vector<16x128xf32>
      tpu.vector_store %arg5[%c0_26, %42], %41 {strides = array<i32>} : memref<16x128xf32, #tpu.memory_space<vmem>>, vector<16x128xf32>,
      %c1_i32 = arith.constant 1 : i32
    } else {
    }
    return
  }
  func.func @transform_0(%arg0: i32, %arg1: i32) -> (i32, i32) {
    %c0_i32 = arith.constant 0 : i32
    %c0_i32_0 = arith.constant 0 : i32
    return %arg0, %c0_i32 : i32, i32
  }
  func.func @transform_1(%arg0: i32, %arg1: i32) -> (i32, i32) {
    %c0_i32 = arith.constant 0 : i32
    %c0_i32_0 = arith.constant 0 : i32
    return %c0_i32, %arg1 : i32, i32
  }
  func.func @transform_2(%arg0: i32, %arg1: i32) -> (i32, i32) {
    %c0_i32 = arith.constant 0 : i32
    %c0_i32_0 = arith.constant 0 : i32
    return %c0_i32, %arg1 : i32, i32
  }
  func.func @transform_3(%arg0: i32, %arg1: i32) -> (i32, i32) {
    %c0_i32 = arith.constant 0 : i32
    %c0_i32_0 = arith.constant 0 : i32
    return %arg0, %c0_i32 : i32, i32
  }
}

</mosaic_0001>

<bundles_post_ra>
// kernel: tpu_custom_call.1
= control target key start
LH: loop header
LB: loop body
LE: loop exit
PB: predicated region body
PF: predicated region fallthrough
CT: control target
= control target key end

     0   :  { %8 = vsyncpa [#allocation6], 0  ;;  %s382_s0 = inlined_call_operand.hbm [shape: bf16[16,32], index: 0, kind: input, shape index: {}]   ;;  %s383_s1 = inlined_call_operand.hbm [shape: bf16[32,128], index: 1, kind: input, shape index: {}]   ;;  %s384_s2 = inlined_call_operand.vmem [shape: f32[1,128], index: 2, kind: input, shape index: {}]   ;;  %s385_s3 = inlined_call_operand.hbm [shape: f32[16,128], index: 3, kind: output, shape index: {}]  }
   0x1   :  { %9 = vsyncpa [#allocation9], 0 }
   0x2   :  { %10 = vsyncpa [#allocation7], 0  ;;  %s15_s14 = sshll.u32 %s382_s0, 4  ;;  %s322_s15 = smov [#allocation5]   ;;  %s16_s14 = int_to_ptr.hbm [resolvable:$true] %s15_s14 }
   0x3   :  { %s17_s16 = sshll.u32 %s322_s15, 4  ;;  %s28_s19 = sshll.u32 %s383_s1, 4  ;;  %s18_s16 = int_to_ptr.vmem [resolvable:$true] %s17_s16  ;;  %s29_s19 = int_to_ptr.hbm [resolvable:$true] %s28_s19 }
   0x4   :  { %s323_s20 = smov 64   ;;  %s324_s21 = smov 4  }
   0x5   :  { %23 = dma.hbm_to_vmem [thread:$0]  %s16_s14, 128, %s18_s16, [#allocation6], %s323_s20, %s323_s20, %s324_s21  }
   0x6   :  { %s325_s22 = smov [#allocation8]  }
   0x7   :  { %s30_s23 = sshll.u32 %s325_s22, 4  ;;  %s31_s23 = int_to_ptr.vmem [resolvable:$true] %s30_s23 }
   0x8   :  { %36 = dma.hbm_to_vmem [thread:$0]  %s29_s19, 256, %s31_s23, [#allocation9], %s323_s20, %s323_s20, %s324_s21  }
   0x9   :  { %316 = dma.done.wait [#allocation6], 128  }
   0xa   :  { %317 = vsyncadd [#allocation6], 4294967168 }
   0xb   :  { %318 = dma.done.wait [#allocation9], 256  }
   0xc   :  { %319 = vsyncadd [#allocation9], 4294967040  ;;  %v218_v0 = vld [vmem:[#allocation8 + $0x8] sm:$0xff]  ;;  %v217_v1 = vld [vmem:[#allocation8] sm:$0xff]  ;;  %vm84_vm0 = vcmask 261120   ;;  %vm52_vm1 = vcmask 7168  }
   0xd   :  { %94 = vmatpush.bf16.msra.mxu0 %v218_v0  ;;  %v216_v2 = vld [vmem:[#allocation5] sm:$0xff]  ;;  %v326_v3 = vmov -inf   ;;  %v327_v9 = vmov 0   ;;  %v328_v10 = vmov 0.0   ;;  %s188_s27 = sshll.u32 %s385_s3, 4  ;;  %s330_s28 = smov 128   ;;  %s189_s27 = int_to_ptr.hbm [resolvable:$true] %s188_s27 }
   0xe   :  { %53 = vst.msk [vmem:[#allocation3] sm:$0xff] %vm52_vm1, %v326_v3  ;;  %v231_v4 = vld [vmem:[%s384_s2] ss:$0 sm:$0xff]  ;;  %229 = vset.pattern.permute.xlu1 %v327_v9  ;;  %230 = vset.pattern.permute.xlu0 %v327_v9  ;;  %s329_s2 = smov [#allocation10]   ;;  %s331_s29 = smov 8  }
   0xf   :  { %54 = vst.msk [vmem:[#allocation3 + $0x8] sm:$0xff] %vm52_vm1, %v326_v3  ;;  %s186_s24 = sshll.u32 %s329_s2, 4  ;;  %s187_s24 = int_to_ptr.vmem [resolvable:$true] %s186_s24 }
  0x10   :  { %55 = vst.msk [vmem:[#allocation4] sm:$0xff] %vm52_vm1, %v328_v10 }
  0x11   :  { %95 = vmatpush.bf16.msra.mxu0 %v217_v1  ;;  %56 = vst.msk [vmem:[#allocation4 + $0x8] sm:$0xff] %vm52_vm1, %v328_v10 }
  0x14   :  { %215 = vmatmul.msk.bf16.vlgmr.msra.gmra.mxu0 %vm84_vm0, %v216_v2 }
  0x15   :  { %v102_v11 = vld [vmem:[#allocation3] sm:$0xff] }
  0x16   :  { %v103_v15 = vld [vmem:[#allocation3 + $0x8] sm:$0xff] }
  0x17   :  { %v110_v30 = vld [vmem:[#allocation4] sm:$0xff] }
  0x18   :  { %v111_v35 = vld [vmem:[#allocation4 + $0x8] sm:$0xff] }
  0x91   :  { %v97_v5 = vpop.f32.mrf.mxu0 }
  0x92   :  { %v363_v6 = vadd.f32 %v231_v4, %v97_v5 }
  0x94   :  { %104 = vmax.xlane.f32.xlu0 %v363_v6 }
  0x99   :  { %v99_v7 = vpop.f32.mrf.mxu0 }
  0x9a   :  { %v366_v8 = vadd.f32 %v231_v4, %v99_v7 }
  0x9c   :  { %106 = vmax.xlane.f32.xlu0 %v366_v8 }
 0x107   :  { %v105_v12 = vpop.xlane.xlu0 %104 }
 0x108   :  { %v108_v13 = vmax.f32 %v102_v11, %v105_v12 }
 0x10a   :  { %v112_v14 = vsub.f32 %v102_v11, %v108_v13  ;;  %145 = vst.msk [vmem:[#allocation3] sm:$0xff] %vm52_vm1, %v108_v13  ;;  %122 = vperm.xlu1 %229, %v108_v13  }
 0x10c   :  { %v114_v27 = vmul.f32 1.442695, %v112_v14 }
 0x10f   :  { %v107_v16 = vpop.xlane.xlu0 %106 }
 0x110   :  { %v109_v17 = vmax.f32 %v103_v15, %v107_v16 }
 0x111   :  { %v156_v43 = vld [vmem:[#allocation3] sm:$0xff] }
 0x112   :  { %v113_v18 = vsub.f32 %v103_v15, %v109_v17  ;;  %146 = vst.msk [vmem:[#allocation3 + $0x8] sm:$0xff] %vm52_vm1, %v109_v17  ;;  %127 = vperm.xlu1 %229, %v109_v17  }
 0x114   :  { %v116_v28 = vmul.f32 1.442695, %v113_v18 }
 0x119   :  { %v157_v47 = vld [vmem:[#allocation3 + $0x8] sm:$0xff] }
 0x17c   :  { %v123_v19 = vpop.permute.xlu1 %122 }
 0x17d   :  { %v130_v20 = vsub.f32 %v363_v6, %v123_v19 }
 0x17f   :  { %v132_v21 = vmul.f32 1.442695, %v130_v20 }
 0x181   :  { %232 = vpow2.f32 %v132_v21 }
 0x184   :  { %v128_v22 = vpop.permute.xlu1 %127 }
 0x185   :  { %v131_v23 = vsub.f32 %v366_v8, %v128_v22 }
 0x187   :  { %v233_v24 = vpop.eup %232  ;;  %v134_v25 = vmul.f32 1.442695, %v131_v23 }
 0x188   :  { %136 = vadd.xlane.f32.xlu2 %v233_v24 }
 0x189   :  { %234 = vpow2.f32 %v134_v25 }
 0x18a   :  { %236 = vpow2.f32 %v114_v27 }
 0x18b   :  { %238 = vpow2.f32 %v116_v28 }
 0x18f   :  { %v235_v26 = vpop.eup %234 }
 0x190   :  { %138 = vadd.xlane.f32.xlu2 %v235_v26  ;;  %v237_v29 = vpop.eup %236 }
 0x191   :  { %v118_v31 = vmul.f32 %v237_v29, %v110_v30  ;;  %v239_v34 = vpop.eup %238 }
 0x192   :  { %v119_v36 = vmul.f32 %v239_v34, %v111_v35 }
 0x1fb   :  { %v137_v32 = vpop.xlane.xlu2 %136 }
 0x1fc   :  { %v140_v33 = vadd.f32 %v137_v32, %v118_v31 }
 0x1fe   :  { %143 = vst.msk [vmem:[#allocation4] sm:$0xff] %vm52_vm1, %v140_v33 }
 0x203   :  { %v139_v37 = vpop.xlane.xlu2 %138 }
 0x204   :  { %v141_v38 = vadd.f32 %v139_v37, %v119_v36 }
 0x205   :  { %v158_v39 = vld [vmem:[#allocation4] sm:$0xff] }
 0x206   :  { %144 = vst.msk [vmem:[#allocation4 + $0x8] sm:$0xff] %vm52_vm1, %v141_v38  ;;  %240 = vlog2.f32 %v158_v39 }
 0x20c   :  { %v241_v40 = vpop.eup %240 }
 0x20d   :  { %v161_v41 = vmul.f32 0.6931472, %v241_v40  ;;  %v159_v42 = vld [vmem:[#allocation4 + $0x8] sm:$0xff] }
 0x20e   :  { %242 = vlog2.f32 %v159_v42 }
 0x20f   :  { %v164_v44 = vadd.f32 %v161_v41, %v156_v43 }
 0x211   :  { %170 = vperm.xlu0 %230, %v164_v44  }
 0x214   :  { %v243_v45 = vpop.eup %242 }
 0x215   :  { %v163_v46 = vmul.f32 0.6931472, %v243_v45 }
 0x217   :  { %v165_v48 = vadd.f32 %v163_v46, %v157_v47 }
 0x219   :  { %175 = vperm.xlu1 %229, %v165_v48  }
 0x283   :  { %v171_v49 = vpop.permute.xlu0 %170 }
 0x284   :  { %v178_v50 = vsub.f32 %v363_v6, %v171_v49 }
 0x286   :  { %180 = vst [vmem:[#allocation10] sm:$0xff] %v178_v50 }
 0x28b   :  { %v176_v51 = vpop.permute.xlu1 %175 }
 0x28c   :  { %v179_v52 = vsub.f32 %v366_v8, %v176_v51 }
 0x28e   :  { %181 = vst [vmem:[#allocation10 + $0x8] sm:$0xff] %v179_v52 }
 0x28f   :  { %194 = dma.vmem_to_hbm [thread:$0]  %s187_s24, 256, %s189_s27, [#allocation7], %s330_s28, %s330_s28, %s331_s29  }
 0x290   :  { %320 = dma.done.wait [#allocation7], 256  }
 0x291   :  { %321 = vsyncadd [#allocation7], 4294967040 }
 0x292   :  { %199 = vsyncpa [#allocation6], 1 }
 0x293   :  { %200 = vsyncpa [#allocation9], 1 }
 0x294   :  { %201 = vsyncpa [#allocation7], 1 }

</bundles_post_ra>
